<compile_context>
chip_gen: v6e
topology: v6e:2x2x1
jax: 0.10.0
libtpu: 0.0.40
codegen_flags: <defaults>
</compile_context>

<pallas_src>
import functools

import jax
import jax.numpy as jnp
from jax import lax
from jax.experimental import pallas as pl
from jax.experimental.pallas import tpu as pltpu

_VMEM = pltpu.MemorySpace.VMEM
_SMEM = pltpu.MemorySpace.SMEM
# Above the 32 MiB default scoped limit, still inside v7x's 64 MiB physical VMEM.
_VMEM_LIMIT = 48 * 1024 * 1024


def _round_up(x, m):
    return ((x + m - 1) // m) * m


def _pick_tile(dim, max_tile, granule):
    """Either cover the whole dim (no padding) or use a `granule`-aligned tile."""
    if dim <= max_tile:
        return dim, dim
    assert max_tile % granule == 0, "tiled block size must be granule aligned"
    return max_tile, _round_up(dim, max_tile)


# ----------------------------------------------------------------------------
# RBF multi-kernel MMD (MMDLoss, kernel_type='rbf', fix_sigma=None)
# ----------------------------------------------------------------------------
def _mmd_bandwidth_kernel(x_ref, bw_ref, q_acc, m_acc, *, n, kernel_mul, kernel_num):
    """Row-block accumulation of sum||x||^2 and sum(x); emits the bandwidth.

    Zero-padded rows contribute nothing to either accumulator."""
    i = pl.program_id(0)

    @pl.when(i == 0)
    def _():
        q_acc[...] = jnp.zeros_like(q_acc)
        m_acc[...] = jnp.zeros_like(m_acc)

    x = x_ref[...].astype(jnp.float32)
    q_acc[...] += jnp.sum(x * x, keepdims=True)              # (1, 1)
    m_acc[...] += jnp.sum(x, axis=0, keepdims=True)           # (1, d)

    # Cheap; written every step so the output is always initialized -- only the
    # last step's (complete) value survives.
    m = m_acc[...]
    sum_l2 = 2.0 * float(n) * q_acc[...] - 2.0 * jnp.sum(m * m, keepdims=True)
    bw_ref[...] = (sum_l2 * (1.0 / float(n * n - n))
                   * (1.0 / (kernel_mul ** (kernel_num // 2))))


def _mmd_rbf_tile_kernel(bw_ref, xr_ref, xc_ref, out_ref, *,
                         bs, bt, n, rb, kernel_mul, kernel_num):
    i = pl.program_id(0)
    j = pl.program_id(1)

    @pl.when(jnp.logical_and(i == 0, j == 0))
    def _():
        out_ref[...] = jnp.zeros_like(out_ref)

    xr = xr_ref[...]                                  # (rb, d), native dtype
    xc = xc_ref[...]                                  # (rb, d), native dtype
    d = xr.shape[1]
    dn = (((1,), (1,)), ((), ()))                     # contract the feature dim

    # Gram tile on the MXU, native operands, f32 accumulation.
    g = lax.dot_general(xr, xc, dn, preferred_element_type=jnp.float32)      # (rb, rb)

    # Squared norms in f32; the row form uses a ones(1,d) matmul so no narrow
    # sublane<->lane transpose is needed.
    xr_f = xr.astype(jnp.float32)
    xc_f = xc.astype(jnp.float32)
    sq_r = jnp.sum(xr_f * xr_f, axis=1, keepdims=True)                       # (rb, 1)
    ones_row = jnp.ones((1, d), jnp.float32)
    sq_c = lax.dot_general(ones_row, xc_f * xc_f, dn,
                           preferred_element_type=jnp.float32)               # (1, rb)

    dist = jnp.maximum(sq_r + sq_c - 2.0 * g, 0.0)                           # (rb, rb)

    # Per-element quadrant weights: +1/bs^2 (XX), +1/bt^2 (YY), -1/(bs*bt)
    # (XY and YX); zero for zero-padded rows/cols.  Reproduces
    # mean(XX)+mean(YY)-mean(XY)-mean(YX) exactly, also for bs != bt.
    row = i * rb + lax.broadcasted_iota(jnp.int32, (rb, rb), 0)
    col = j * rb + lax.broadcasted_iota(jnp.int32, (rb, rb), 1)
    w_ss = jnp.float32(1.0 / float(bs * bs))
    w_tt = jnp.float32(1.0 / float(bt * bt))
    w_st = jnp.float32(-1.0 / float(bs * bt))
    w = jnp.where(row < bs,
                  jnp.where(col < bs, w_ss, w_st),
                  jnp.where(col < bs, w_st, w_tt))
    w = jnp.where(jnp.logical_and(row < n, col < n), w, jnp.float32(0.0))

    bw = bw_ref[0, 0]
    # NOTE: bandwidth == 0 (all samples identical) yields NaN, same as PyTorch.

    # Multi-kernel sum: weighted lane reductions accumulated into an (rb, 1)
    # column (VALU adds), a single sublane reduce per tile at the end.
    col_acc = jnp.zeros((rb, 1), jnp.float32)
    if kernel_mul == 2.0:
        # One exp at the LARGEST bandwidth; the rest by repeated squaring:
        #   exp(-l2/(bw*2^i)) = e ** 2^(k-1-i),  e = exp(-l2/(bw*2^(k-1)))
        # (~kernel_num x fewer EUP ops; the squaring chain stays in f32).
        # TODO(synk): bf16 exp on v6e/v7x EUPs for the non-default kernel_mul path.
        scale = -1.0 / (bw * (kernel_mul ** (kernel_num - 1)))   # divide hoisted
        e = jnp.exp(dist * scale)
        for q in range(kernel_num):
            if q > 0:
                e = e * e
            col_acc = col_acc + jnp.sum(w * e, axis=1, keepdims=True)
    else:
        for q in range(kernel_num):
            scale = -1.0 / (bw * (kernel_mul ** q))
            col_acc = col_acc + jnp.sum(w * jnp.exp(dist * scale),
                                        axis=1, keepdims=True)

    out_ref[...] += jnp.sum(col_acc, axis=0, keepdims=True)


@functools.partial(jax.jit, static_argnames=("kernel_mul", "kernel_num", "block_rows"))
def mmd_rbf(source, target, kernel_mul=2.0, kernel_num=5, block_rows=256):
    """Multi-kernel RBF MMD^2, identical to MMDLoss(kernel_type='rbf').forward."""
    kernel_mul = float(kernel_mul)
    kernel_num = int(kernel_num)
    bs, d = source.shape
    bt, d_t = target.shape
    assert d == d_t
    n = bs + bt

    total = jnp.concatenate([source, target], axis=0)          # (n, d), native dtype
    rb, n_pad = _pick_tile(n, block_rows, granule=8)
    if n_pad != n:
        total = jnp.pad(total, ((0, n_pad - n), (0, 0)))
    nblk = n_pad // rb

    # ---- stage A: data-dependent bandwidth (fix_sigma is None in MMDLoss) ----
    bw = pl.pallas_call(
        functools.partial(_mmd_bandwidth_kernel, n=n,
                          kernel_mul=kernel_mul, kernel_num=kernel_num),
        out_shape=jax.ShapeDtypeStruct((1, 1), jnp.float32),
        grid_spec=pltpu.PrefetchScalarGridSpec(
            num_scalar_prefetch=0,
            grid=(nblk,),
            in_specs=[pl.BlockSpec((rb, d), lambda i: (i, 0), memory_space=_VMEM)],
            out_specs=pl.BlockSpec((1, 1), lambda i: (0, 0), memory_space=_VMEM),
            scratch_shapes=[pltpu.VMEM((1, 1), jnp.float32),
                            pltpu.VMEM((1, d), jnp.float32)]),
        compiler_params=pltpu.CompilerParams(dimension_semantics=("arbitrary",)),
    )(total)

    # ---- stage B: tiled gram / multi-kernel / weighted-mean accumulation ----
    n_tr = nblk * nblk * rb * rb
    ce = pl.CostEstimate(
        flops=2 * d * n_tr + 10 * kernel_num * n_tr,
        transcendentals=n_tr if kernel_mul == 2.0 else kernel_num * n_tr,
        bytes_accessed=2 * nblk * n_pad * d * total.dtype.itemsize + 8,
    )
    out = pl.pallas_call(
        functools.partial(_mmd_rbf_tile_kernel, bs=bs, bt=bt, n=n, rb=rb,
                          kernel_mul=kernel_mul, kernel_num=kernel_num),
        out_shape=jax.ShapeDtypeStruct((1, 1), jnp.float32),
        grid_spec=pltpu.PrefetchScalarGridSpec(
            num_scalar_prefetch=0,
            grid=(nblk, nblk),
            in_specs=[pl.BlockSpec(memory_space=_SMEM),         # bandwidth scalar
                      pl.BlockSpec((rb, d), lambda i, j: (i, 0), memory_space=_VMEM),
                      pl.BlockSpec((rb, d), lambda i, j: (j, 0), memory_space=_VMEM)],
            out_specs=pl.BlockSpec((1, 1), lambda i, j: (0, 0), memory_space=_VMEM)),
        compiler_params=pltpu.CompilerParams(
            # All tiles reduce into one resident scalar block -> keep both axes
            # "arbitrary" (see TODO at top for the dual-TC variant).
            dimension_semantics=("arbitrary", "arbitrary"),
            vmem_limit_bytes=_VMEM_LIMIT),
        cost_estimate=ce,
    )(bw, total, total)
    return out[0, 0]


# ----------------------------------------------------------------------------
# Linear MMD (MMDLoss, kernel_type='linear')
# ----------------------------------------------------------------------------
def _linear_mmd_kernel(src_ref, tgt_ref, out_ref):
    s = src_ref[...].astype(jnp.float32)      # matches torch's .float() upcast
    t = tgt_ref[...].astype(jnp.float32)
    delta = jnp.mean(s, axis=0, keepdims=True) - jnp.mean(t, axis=0, keepdims=True)
    out_ref[...] = jnp.sum(delta * delta, keepdims=True)


@jax.jit
def linear_mmd(source, target):
    # TODO(synk): row-block grid for batches that do not fit VMEM; this O(N*D)
    # loss is memory-bound and rarely worth tiling at realistic batch sizes.
    ce = pl.CostEstimate(
        flops=3 * (source.shape[0] + target.shape[0]) * source.shape[1],
        transcendentals=0,
        bytes_accessed=(source.size * source.dtype.itemsize
                        + target.size * target.dtype.itemsize + 4))
    out = pl.pallas_call(
        _linear_mmd_kernel,
        out_shape=jax.ShapeDtypeStruct((1, 1), jnp.float32),
        in_specs=[pl.BlockSpec(source.shape, lambda: (0, 0), memory_space=_VMEM),
                  pl.BlockSpec(target.shape, lambda: (0, 0), memory_space=_VMEM)],
        out_specs=pl.BlockSpec((1, 1), lambda: (0, 0), memory_space=_VMEM),
        cost_estimate=ce,
    )(source, target)
    return out[0, 0]


# ----------------------------------------------------------------------------
# CORAL
# ----------------------------------------------------------------------------
def _coral_tile_kernel(sT_ref, s_ref, tT_ref, t_ref, out_ref, cov_acc, *,
                       inv_ns1, inv_nt1, inv_4d2):
    i = pl.program_id(0)
    j = pl.program_id(1)
    k = pl.program_id(2)
    nk = pl.num_programs(2)

    @pl.when(jnp.logical_and(jnp.logical_and(i == 0, j == 0), k == 0))
    def _():
        out_ref[...] = jnp.zeros_like(out_ref)

    @pl.when(k == 0)
    def _():
        cov_acc[...] = jnp.zeros_like(cov_acc)

    # Operands arrive pre-transposed from the wrapper: LHS contraction on the
    # lane axis, RHS contraction on the sublane axis -> MXU-native, no vxpose.
    dn = (((1,), (0,)), ((), ()))
    g_s = lax.dot_general(sT_ref[...], s_ref[...], dn,
                          preferred_element_type=jnp.float32)                # (td, td)
    g_t = lax.dot_general(tT_ref[...], t_ref[...], dn,
                          preferred_element_type=jnp.float32)
    cov_acc[...] += g_s * inv_ns1 - g_t * inv_nt1

    @pl.when(k == nk - 1)
    def _():
        diff = cov_acc[...]
        out_ref[...] += jnp.sum(diff * diff, keepdims=True) * inv_4d2


@functools.partial(jax.jit, static_argnames=("block_d", "block_n"))
def coral(source, target, block_d=256, block_n=256):
    """CORAL loss (covariance alignment), identical to the PyTorch CORAL()."""
    ns, d = source.shape
    nt, d_t = target.shape
    assert d == d_t

    def _center(x):
        xf = x.astype(jnp.float32)
        # Centering in f32, cast back to the native dtype so the gram matmuls
        # stay on the native-width MXU path.
        return (jnp.mean(xf, axis=0, keepdims=True) - xf).astype(x.dtype)

    s_c = _center(source)
    t_c = _center(target)

    td, d_pad = _pick_tile(d, block_d, granule=128)
    nb = max(ns, nt)
    tb, nb_pad = _pick_tile(nb, block_n, granule=128)

    def _pad(x, rows):
        if rows == nb_pad and d == d_pad:
            return x
        # Zero rows/cols of *centered* data contribute nothing to either gram.
        return jnp.pad(x, ((0, nb_pad - rows), (0, d_pad - d)))

    s_p = _pad(s_c, ns)
    t_p = _pad(t_c, nt)
    s_pT = s_p.T                               # (d_pad, nb_pad), wrapper-side transpose
    t_pT = t_p.T

    grid = (d_pad // td, d_pad // td, nb_pad // tb)
    ce = pl.CostEstimate(
        flops=4 * d_pad * d_pad * nb_pad + 3 * d_pad * d_pad,
        transcendentals=0,
        bytes_accessed=4 * nb_pad * d_pad * source.dtype.itemsize * (d_pad // td) + 4)
    out = pl.pallas_call(
        functools.partial(_coral_tile_kernel,
                          inv_ns1=1.0 / float(ns - 1),
                          inv_nt1=1.0 / float(nt - 1),
                          inv_4d2=1.0 / float(4 * d * d)),
        out_shape=jax.ShapeDtypeStruct((1, 1), jnp.float32),
        grid_spec=pltpu.PrefetchScalarGridSpec(
            num_scalar_prefetch=0,
            grid=grid,
            in_specs=[pl.BlockSpec((td, tb), lambda i, j, k: (i, k), memory_space=_VMEM),
                      pl.BlockSpec((tb, td), lambda i, j, k: (k, j), memory_space=_VMEM),
                      pl.BlockSpec((td, tb), lambda i, j, k: (i, k), memory_space=_VMEM),
                      pl.BlockSpec((tb, td), lambda i, j, k: (k, j), memory_space=_VMEM)],
            out_specs=pl.BlockSpec((1, 1), lambda i, j, k: (0, 0), memory_space=_VMEM),
            scratch_shapes=[pltpu.VMEM((td, td), jnp.float32)]),
        compiler_params=pltpu.CompilerParams(
            dimension_semantics=("arbitrary", "arbitrary", "arbitrary"),
            vmem_limit_bytes=_VMEM_LIMIT),
        cost_estimate=ce,
    )(s_pT, s_p, t_pT, t_p)
    return out[0, 0]


# ----------------------------------------------------------------------------
# TransferLoss dispatcher (mirrors the PyTorch module's __init__/forward)
# ----------------------------------------------------------------------------
class TransferLoss:
    def __init__(self, loss_type, **kwargs):
        self.loss_type = loss_type
        if loss_type == 'mmd':
            kernel_type = kwargs.get('kernel_type', 'rbf')
            kernel_mul = float(kwargs.get('kernel_mul', 2.0))
            kernel_num = int(kwargs.get('kernel_num', 5))
            if kernel_type == 'rbf':
                self._fn = functools.partial(mmd_rbf, kernel_mul=kernel_mul,
                                             kernel_num=kernel_num)
            else:
                self._fn = linear_mmd
        elif loss_type == 'coral':
            self._fn = coral
        # TODO(synk): 'bnm' needs an SVD (torch.svd) -- no Pallas/Mosaic SVD primitive.
        # TODO(synk): 'adv'/'daan' need a trainable Discriminator (BatchNorm running
        #             stats, BCE, gradient reversal) -- training machinery, not a
        #             single forward kernel.
        # TODO(synk): 'lmmd' needs host-side numpy label bookkeeping (cal_weight).
        # TODO(synk): 'weight' needs a cvxopt QP solve (KMM.fit).
        else:
            print('WARNING: No valid transfer loss function is used.')
            self._fn = lambda s, t: jnp.float32(0.0)

    def __call__(self, source, target, **kwargs):
        return self._fn(source, target)


# ----------------------------------------------------------------------------
# Pure-JAX references (for correctness checks)
# ----------------------------------------------------------------------------
def _mmd_rbf_ref(s, t, kernel_mul=2.0, kernel_num=5):
    total = jnp.concatenate([s, t], axis=0).astype(jnp.float32)
    n = total.shape[0]
    l2 = jnp.sum((total[:, None, :] - total[None, :, :]) ** 2, axis=-1)
    bw = jnp.sum(l2) / (n * n - n) / (kernel_mul ** (kernel_num // 2))
    kern = sum(jnp.exp(-l2 / (bw * kernel_mul ** i)) for i in range(kernel_num))
    b = s.shape[0]
    return (jnp.mean(kern[:b, :b]) + jnp.mean(kern[b:, b:])
            - jnp.mean(kern[:b, b:]) - jnp.mean(kern[b:, :b]))


def _coral_ref(s, t):
    s = s.astype(jnp.float32)
    t = t.astype(jnp.float32)
    ns, d = s.shape
    nt = t.shape[0]
    xm = jnp.mean(s, 0, keepdims=True) - s
    xc = xm.T @ xm / (ns - 1)
    xmt = jnp.mean(t, 0, keepdims=True) - t
    xct = xmt.T @ xmt / (nt - 1)
    return jnp.sum((xc - xct) ** 2) / (4 * d * d)


def _linear_mmd_ref(s, t):
    delta = jnp.mean(s.astype(jnp.float32), 0) - jnp.mean(t.astype(jnp.float32), 0)
    return jnp.dot(delta, delta)


if __name__ == "__main__":
    key = jax.random.PRNGKey(0)
    k1, k2, k3, k4 = jax.random.split(key, 4)

    # Small shapes (single-tile grids) consistent with the module's (batch, feature) inputs.
    src = jax.random.normal(k1, (8, 32), dtype=jnp.float32)
    tgt = 1.3 * jax.random.normal(k2, (8, 32), dtype=jnp.float32) + 0.5

    mmd_loss = TransferLoss('mmd')(src, tgt)
    coral_loss = TransferLoss('coral')(src, tgt)
    lin_loss = TransferLoss('mmd', kernel_type='linear')(src, tgt)
    jax.block_until_ready((mmd_loss, coral_loss, lin_loss))

    assert jnp.allclose(mmd_loss, _mmd_rbf_ref(src, tgt), rtol=5e-2, atol=1e-4)
    assert jnp.allclose(coral_loss, _coral_ref(src, tgt), rtol=5e-2, atol=1e-4)
    assert jnp.allclose(lin_loss, _linear_mmd_ref(src, tgt), rtol=5e-2, atol=1e-4)

    # Larger shapes forcing the tiled / zero-padded grid paths.
    src2 = jax.random.normal(k3, (72, 96), dtype=jnp.float32)
    tgt2 = 0.8 * jax.random.normal(k4, (72, 96), dtype=jnp.float32) - 0.25
    mmd2 = mmd_rbf(src2, tgt2, block_rows=64)            # n=144 -> padded 192, 3x3 grid
    assert jnp.allclose(mmd2, _mmd_rbf_ref(src2, tgt2), rtol=5e-2, atol=1e-4)

    src3 = jax.random.normal(k3, (200, 200), dtype=jnp.float32)
    tgt3 = 1.1 * jax.random.normal(k4, (136, 200), dtype=jnp.float32) + 0.3
    coral2 = coral(src3, tgt3, block_d=128, block_n=128)  # pads to 256, (2, 2, 2) grid
    assert jnp.allclose(coral2, _coral_ref(src3, tgt3), rtol=5e-2, atol=1e-6)

    # Native-dtype (bf16) MXU path; compared against the f32 reference evaluated
    # on the same bf16-rounded inputs.
    src_bf = src.astype(jnp.bfloat16)
    tgt_bf = tgt.astype(jnp.bfloat16)
    mmd_bf = mmd_rbf(src_bf, tgt_bf)
    assert jnp.allclose(mmd_bf, _mmd_rbf_ref(src_bf, tgt_bf), rtol=5e-2, atol=1e-3)

    jax.block_until_ready((mmd2, coral2, mmd_bf))
    print("KERNEL_OK")
</pallas_src>

<mosaic_0001>
module attributes {stable_mosaic.version = 11 : i64} {
  func.func @_mmd_bandwidth_kernel(%arg0: i32, %arg1: memref<16x32xf32, #tpu.memory_space<vmem>>, %arg2: memref<1x1xf32, #tpu.memory_space<vmem>>, %arg3: memref<1x1xf32, #tpu.memory_space<vmem>>, %arg4: memref<1x32xf32, #tpu.memory_space<vmem>>) attributes {dimension_semantics = [#tpu.dimension_semantics<arbitrary>], iteration_bounds = array<i64: 1>, scalar_prefetch = 0 : i64, scratch_operands = 2 : i64, tpu.core_type = #tpu.core_type<tc>, window_params = [{transform_indices = @transform_0, window_bounds = array<i64: 16, 32>}, {pipeline_mode = #tpu.pipeline_mode<synchronous>, transform_indices = @transform_1, window_bounds = array<i64: 1, 1>}]} {
    %c0_i32 = arith.constant 0 : i32
    %0 = arith.cmpi eq, %arg0, %c0_i32 : i32
    %1 = arith.extui %0 : i1 to i32
    %c0_i32_0 = arith.constant 0 : i32
    %2 = arith.cmpi ne, %1, %c0_i32_0 : i32
    scf.if %2 {
      %cst_22 = arith.constant 0.000000e+00 : f32
      %36 = vector.broadcast %cst_22 : f32 to vector<1x1xf32>
      %c0_23 = arith.constant 0 : index
      %c0_24 = arith.constant 0 : index
      %37 = vector.load %arg3[%c0_23, %c0_24] : memref<1x1xf32, #tpu.memory_space<vmem>>, vector<1x1xf32>
      tpu.vector_store %arg3[%c0_23, %c0_24], %36 {strides = array<i32>} : memref<1x1xf32, #tpu.memory_space<vmem>>, vector<1x1xf32>,
      %cst_25 = arith.constant 0.000000e+00 : f32
      %38 = vector.broadcast %cst_25 : f32 to vector<1x32xf32>
      %c0_26 = arith.constant 0 : index
      %c0_27 = arith.constant 0 : index
      %39 = vector.load %arg4[%c0_26, %c0_27] : memref<1x32xf32, #tpu.memory_space<vmem>>, vector<1x32xf32>
      tpu.vector_store %arg4[%c0_26, %c0_27], %38 {strides = array<i32>} : memref<1x32xf32, #tpu.memory_space<vmem>>, vector<1x32xf32>,
    } else {
    }
    %c0 = arith.constant 0 : index
    %c0_1 = arith.constant 0 : index
    %3 = vector.load %arg1[%c0, %c0_1] : memref<16x32xf32, #tpu.memory_space<vmem>>, vector<16x32xf32>
    %c0_2 = arith.constant 0 : index
    %c0_3 = arith.constant 0 : index
    %4 = vector.load %arg3[%c0_2, %c0_3] : memref<1x1xf32, #tpu.memory_space<vmem>>, vector<1x1xf32>
    %5 = arith.mulf %3, %3 : vector<16x32xf32>
    %6 = vector.shape_cast %5 : vector<16x32xf32> to vector<1x16x32xf32>
    %cst = arith.constant dense<0.000000e+00> : vector<1xf32>
    %7 = vector.multi_reduction <add>, %6, %cst [1, 2] : vector<1x16x32xf32> to vector<1xf32>
    %8 = vector.shape_cast %7 : vector<1xf32> to vector<1x1x1xf32>
    %9 = vector.extract %8[0, 0, 0] : f32 from vector<1x1x1xf32>
    %10 = vector.broadcast %9 : f32 to vector<1x1xf32>
    %11 = arith.addf %4, %10 : vector<1x1xf32>
    %c0_4 = arith.constant 0 : index
    %c0_5 = arith.constant 0 : index
    %12 = vector.load %arg3[%c0_4, %c0_5] : memref<1x1xf32, #tpu.memory_space<vmem>>, vector<1x1xf32>
    tpu.vector_store %arg3[%c0_4, %c0_5], %11 {strides = array<i32>} : memref<1x1xf32, #tpu.memory_space<vmem>>, vector<1x1xf32>,
    %c0_6 = arith.constant 0 : index
    %c0_7 = arith.constant 0 : index
    %13 = vector.load %arg4[%c0_6, %c0_7] : memref<1x32xf32, #tpu.memory_space<vmem>>, vector<1x32xf32>
    %cst_8 = arith.constant dense<0.000000e+00> : vector<32xf32>
    %14 = vector.multi_reduction <add>, %3, %cst_8 [0] : vector<16x32xf32> to vector<32xf32>
    %15 = vector.shape_cast %14 : vector<32xf32> to vector<1x32xf32>
    %16 = arith.addf %13, %15 : vector<1x32xf32>
    %c0_9 = arith.constant 0 : index
    %c0_10 = arith.constant 0 : index
    %17 = vector.load %arg4[%c0_9, %c0_10] : memref<1x32xf32, #tpu.memory_space<vmem>>, vector<1x32xf32>
    tpu.vector_store %arg4[%c0_9, %c0_10], %16 {strides = array<i32>} : memref<1x32xf32, #tpu.memory_space<vmem>>, vector<1x32xf32>,
    %c0_11 = arith.constant 0 : index
    %c0_12 = arith.constant 0 : index
    %18 = vector.load %arg4[%c0_11, %c0_12] : memref<1x32xf32, #tpu.memory_space<vmem>>, vector<1x32xf32>
    %c0_13 = arith.constant 0 : index
    %c0_14 = arith.constant 0 : index
    %19 = vector.load %arg3[%c0_13, %c0_14] : memref<1x1xf32, #tpu.memory_space<vmem>>, vector<1x1xf32>
    %cst_15 = arith.constant 3.200000e+01 : f32
    %20 = vector.broadcast %cst_15 : f32 to vector<1x1xf32>
    %21 = arith.mulf %20, %19 : vector<1x1xf32>
    %22 = arith.mulf %18, %18 : vector<1x32xf32>
    %23 = vector.shape_cast %22 : vector<1x32xf32> to vector<1x1x32xf32>
    %cst_16 = arith.constant dense<0.000000e+00> : vector<1xf32>
    %24 = vector.multi_reduction <add>, %23, %cst_16 [1, 2] : vector<1x1x32xf32> to vector<1xf32>
    %25 = vector.shape_cast %24 : vector<1xf32> to vector<1x1x1xf32>
    %26 = vector.extract %25[0, 0, 0] : f32 from vector<1x1x1xf32>
    %27 = vector.broadcast %26 : f32 to vector<1x1xf32>
    %cst_17 = arith.constant 2.000000e+00 : f32
    %28 = vector.broadcast %cst_17 : f32 to vector<1x1xf32>
    %29 = arith.mulf %28, %27 : vector<1x1xf32>
    %30 = arith.subf %21, %29 : vector<1x1xf32>
    %cst_18 = arith.constant 0.00416666688 : f32
    %31 = vector.broadcast %cst_18 : f32 to vector<1x1xf32>
    %32 = arith.mulf %30, %31 : vector<1x1xf32>
    %cst_19 = arith.constant 2.500000e-01 : f32
    %33 = vector.broadcast %cst_19 : f32 to vector<1x1xf32>
    %34 = arith.mulf %32, %33 : vector<1x1xf32>
    %c0_20 = arith.constant 0 : index
    %c0_21 = arith.constant 0 : index
    %35 = vector.load %arg2[%c0_20, %c0_21] : memref<1x1xf32, #tpu.memory_space<vmem>>, vector<1x1xf32>
    tpu.vector_store %arg2[%c0_20, %c0_21], %34 {strides = array<i32>} : memref<1x1xf32, #tpu.memory_space<vmem>>, vector<1x1xf32>,
    return
  }
  func.func @transform_0(%arg0: i32) -> (i32, i32) {
    %c0_i32 = arith.constant 0 : i32
    %c0_i32_0 = arith.constant 0 : i32
    return %arg0, %c0_i32 : i32, i32
  }
  func.func @transform_1(%arg0: i32) -> (i32, i32) {
    %c0_i32 = arith.constant 0 : i32
    %c0_i32_0 = arith.constant 0 : i32
    %c0_i32_1 = arith.constant 0 : i32
    return %c0_i32, %c0_i32_0 : i32, i32
  }
}

module attributes {stable_mosaic.version = 11 : i64} {
  func.func @_mmd_rbf_tile_kernel(%arg0: i32, %arg1: i32, %arg2: memref<1x1xf32, #tpu.memory_space<smem>>, %arg3: memref<16x32xf32, #tpu.memory_space<vmem>>, %arg4: memref<16x32xf32, #tpu.memory_space<vmem>>, %arg5: memref<1x1xf32, #tpu.memory_space<vmem>>) attributes {dimension_semantics = [#tpu.dimension_semantics<arbitrary>, #tpu.dimension_semantics<arbitrary>], iteration_bounds = array<i64: 1, 1>, scalar_prefetch = 0 : i64, scratch_operands = 0 : i64, tpu.core_type = #tpu.core_type<tc>, window_params = [{transform_indices = @transform_0, window_bounds = array<i64: 1, 1>}, {transform_indices = @transform_1, window_bounds = array<i64: 16, 32>}, {transform_indices = @transform_2, window_bounds = array<i64: 16, 32>}, {pipeline_mode = #tpu.pipeline_mode<synchronous>, transform_indices = @transform_3, window_bounds = array<i64: 1, 1>}]} {
    %c0_i32 = arith.constant 0 : i32
    %0 = arith.cmpi eq, %arg0, %c0_i32 : i32
    %c0_i32_0 = arith.constant 0 : i32
    %1 = arith.cmpi eq, %arg1, %c0_i32_0 : i32
    %2 = arith.andi %0, %1 : i1
    %3 = arith.extui %2 : i1 to i32
    %c0_i32_1 = arith.constant 0 : i32
    %4 = arith.cmpi ne, %3, %c0_i32_1 : i32
    scf.if %4 {
      %cst_35 = arith.constant 0.000000e+00 : f32
      %86 = vector.broadcast %cst_35 : f32 to vector<1x1xf32>
      %c0_36 = arith.constant 0 : index
      %c0_37 = arith.constant 0 : index
      %87 = vector.load %arg5[%c0_36, %c0_37] : memref<1x1xf32, #tpu.memory_space<vmem>>, vector<1x1xf32>
      tpu.vector_store %arg5[%c0_36, %c0_37], %86 {strides = array<i32>} : memref<1x1xf32, #tpu.memory_space<vmem>>, vector<1x1xf32>,
    } else {
    }
    %c0 = arith.constant 0 : index
    %c0_2 = arith.constant 0 : index
    %5 = vector.load %arg3[%c0, %c0_2] : memref<16x32xf32, #tpu.memory_space<vmem>>, vector<16x32xf32>
    %c0_3 = arith.constant 0 : index
    %c0_4 = arith.constant 0 : index
    %6 = vector.load %arg4[%c0_3, %c0_4] : memref<16x32xf32, #tpu.memory_space<vmem>>, vector<16x32xf32>
    %cst = arith.constant dense<0.000000e+00> : vector<16x16xf32>
    %7 = tpu.matmul %5, %6, %cst {dimension_numbers = #tpu.dot_dimension_numbers<[1], [1], [0], [0], [0, 0, 1, 0], [], []>} : vector<16x32xf32>, vector<16x32xf32>, vector<16x16xf32> -> vector<16x16xf32>
    %8 = arith.mulf %5, %5 : vector<16x32xf32>
    %cst_5 = arith.constant dense<0.000000e+00> : vector<16xf32>
    %9 = vector.multi_reduction <add>, %8, %cst_5 [1] : vector<16x32xf32> to vector<16xf32>
    %10 = vector.shape_cast %9 : vector<16xf32> to vector<16x1xf32>
    %cst_6 = arith.constant 1.000000e+00 : f32
    %11 = vector.broadcast %cst_6 : f32 to vector<1x32xf32>
    %12 = arith.mulf %6, %6 : vector<16x32xf32>
    %cst_7 = arith.constant dense<0.000000e+00> : vector<1x16xf32>
    %13 = tpu.matmul %11, %12, %cst_7 {dimension_numbers = #tpu.dot_dimension_numbers<[1], [1], [0], [0], [0, 0, 1, 0], [], []>} : vector<1x32xf32>, vector<16x32xf32>, vector<1x16xf32> -> vector<1x16xf32>
    %14 = vector.broadcast %10 : vector<16x1xf32> to vector<16x16xf32>
    %15 = vector.broadcast %13 : vector<1x16xf32> to vector<16x16xf32>
    %16 = arith.addf %14, %15 : vector<16x16xf32>
    %cst_8 = arith.constant 2.000000e+00 : f32
    %17 = vector.broadcast %cst_8 : f32 to vector<16x16xf32>
    %18 = arith.mulf %17, %7 : vector<16x16xf32>
    %19 = arith.subf %16, %18 : vector<16x16xf32>
    %cst_9 = arith.constant 0.000000e+00 : f32
    %20 = vector.broadcast %cst_9 : f32 to vector<16x16xf32>
    %21 = arith.maximumf %19, %20 : vector<16x16xf32>
    %c16_i32 = arith.constant 16 : i32
    %22 = arith.muli %arg0, %c16_i32 : i32
    %23 = tpu.iota {dimensions = array<i32: 0>} : vector<16x16xi32>
    %24 = vector.broadcast %22 : i32 to vector<16x16xi32>
    %25 = arith.addi %24, %23 : vector<16x16xi32>
    %c16_i32_10 = arith.constant 16 : i32
    %26 = arith.muli %arg1, %c16_i32_10 : i32
    %27 = tpu.iota {dimensions = array<i32: 1>} : vector<16x16xi32>
    %28 = vector.broadcast %26 : i32 to vector<16x16xi32>
    %29 = arith.addi %28, %27 : vector<16x16xi32>
    %c8_i32 = arith.constant 8 : i32
    %30 = vector.broadcast %c8_i32 : i32 to vector<16x16xi32>
    %31 = arith.cmpi slt, %25, %30 : vector<16x16xi32>
    %c8_i32_11 = arith.constant 8 : i32
    %32 = vector.broadcast %c8_i32_11 : i32 to vector<16x16xi32>
    %33 = arith.cmpi slt, %29, %32 : vector<16x16xi32>
    %cst_12 = arith.constant 1.562500e-02 : f32
    %cst_13 = arith.constant -1.562500e-02 : f32
    %34 = vector.broadcast %cst_12 : f32 to vector<16x16xf32>
    %35 = vector.broadcast %cst_13 : f32 to vector<16x16xf32>
    %36 = arith.select %33, %34, %35 : vector<16x16xi1>, vector<16x16xf32>
    %c8_i32_14 = arith.constant 8 : i32
    %37 = vector.broadcast %c8_i32_14 : i32 to vector<16x16xi32>
    %38 = arith.cmpi slt, %29, %37 : vector<16x16xi32>
    %cst_15 = arith.constant -1.562500e-02 : f32
    %cst_16 = arith.constant 1.562500e-02 : f32
    %39 = vector.broadcast %cst_15 : f32 to vector<16x16xf32>
    %40 = vector.broadcast %cst_16 : f32 to vector<16x16xf32>
    %41 = arith.select %38, %39, %40 : vector<16x16xi1>, vector<16x16xf32>
    %42 = arith.select %31, %36, %41 : vector<16x16xi1>, vector<16x16xf32>
    %c16_i32_17 = arith.constant 16 : i32
    %43 = vector.broadcast %c16_i32_17 : i32 to vector<16x16xi32>
    %44 = arith.cmpi slt, %25, %43 : vector<16x16xi32>
    %c16_i32_18 = arith.constant 16 : i32
    %45 = vector.broadcast %c16_i32_18 : i32 to vector<16x16xi32>
    %46 = arith.cmpi slt, %29, %45 : vector<16x16xi32>
    %47 = arith.andi %44, %46 : vector<16x16xi1>
    %cst_19 = arith.constant 0.000000e+00 : f32
    %48 = vector.broadcast %cst_19 : f32 to vector<16x16xf32>
    %49 = arith.select %47, %42, %48 : vector<16x16xi1>, vector<16x16xf32>
    %c0_20 = arith.constant 0 : index
    %c0_21 = arith.constant 0 : index
    %50 = memref.load %arg2[%c0_20, %c0_21] : memref<1x1xf32, #tpu.memory_space<smem>>
    %cst_22 = arith.constant 0.000000e+00 : f32
    %51 = vector.broadcast %cst_22 : f32 to vector<16x1xf32>
    %cst_23 = arith.constant 1.600000e+01 : f32
    %52 = arith.mulf %50, %cst_23 : f32
    %cst_24 = arith.constant -1.000000e+00 : f32
    %53 = arith.divf %cst_24, %52 : f32
    %54 = vector.broadcast %53 : f32 to vector<16x16xf32>
    %55 = arith.mulf %21, %54 : vector<16x16xf32>
    %56 = math.exp %55 : vector<16x16xf32>
    %57 = arith.mulf %49, %56 : vector<16x16xf32>
    %cst_25 = arith.constant dense<0.000000e+00> : vector<16xf32>
    %58 = vector.multi_reduction <add>, %57, %cst_25 [1] : vector<16x16xf32> to vector<16xf32>
    %59 = vector.shape_cast %58 : vector<16xf32> to vector<16x1xf32>
    %60 = arith.addf %51, %59 : vector<16x1xf32>
    %61 = arith.mulf %56, %56 : vector<16x16xf32>
    %62 = arith.mulf %49, %61 : vector<16x16xf32>
    %cst_26 = arith.constant dense<0.000000e+00> : vector<16xf32>
    %63 = vector.multi_reduction <add>, %62, %cst_26 [1] : vector<16x16xf32> to vector<16xf32>
    %64 = vector.shape_cast %63 : vector<16xf32> to vector<16x1xf32>
    %65 = arith.addf %60, %64 : vector<16x1xf32>
    %66 = arith.mulf %61, %61 : vector<16x16xf32>
    %67 = arith.mulf %49, %66 : vector<16x16xf32>
    %cst_27 = arith.constant dense<0.000000e+00> : vector<16xf32>
    %68 = vector.multi_reduction <add>, %67, %cst_27 [1] : vector<16x16xf32> to vector<16xf32>
    %69 = vector.shape_cast %68 : vector<16xf32> to vector<16x1xf32>
    %70 = arith.addf %65, %69 : vector<16x1xf32>
    %71 = arith.mulf %66, %66 : vector<16x16xf32>
    %72 = arith.mulf %49, %71 : vector<16x16xf32>
    %cst_28 = arith.constant dense<0.000000e+00> : vector<16xf32>
    %73 = vector.multi_reduction <add>, %72, %cst_28 [1] : vector<16x16xf32> to vector<16xf32>
    %74 = vector.shape_cast %73 : vector<16xf32> to vector<16x1xf32>
    %75 = arith.addf %70, %74 : vector<16x1xf32>
    %76 = arith.mulf %71, %71 : vector<16x16xf32>
    %77 = arith.mulf %49, %76 : vector<16x16xf32>
    %cst_29 = arith.constant dense<0.000000e+00> : vector<16xf32>
    %78 = vector.multi_reduction <add>, %77, %cst_29 [1] : vector<16x16xf32> to vector<16xf32>
    %79 = vector.shape_cast %78 : vector<16xf32> to vector<16x1xf32>
    %80 = arith.addf %75, %79 : vector<16x1xf32>
    %c0_30 = arith.constant 0 : index
    %c0_31 = arith.constant 0 : index
    %81 = vector.load %arg5[%c0_30, %c0_31] : memref<1x1xf32, #tpu.memory_space<vmem>>, vector<1x1xf32>
    %cst_32 = arith.constant dense<0.000000e+00> : vector<1xf32>
    %82 = vector.multi_reduction <add>, %80, %cst_32 [0] : vector<16x1xf32> to vector<1xf32>
    %83 = vector.shape_cast %82 : vector<1xf32> to vector<1x1xf32>
    %84 = arith.addf %81, %83 : vector<1x1xf32>
    %c0_33 = arith.constant 0 : index
    %c0_34 = arith.constant 0 : index
    %85 = vector.load %arg5[%c0_33, %c0_34] : memref<1x1xf32, #tpu.memory_space<vmem>>, vector<1x1xf32>
    tpu.vector_store %arg5[%c0_33, %c0_34], %84 {strides = array<i32>} : memref<1x1xf32, #tpu.memory_space<vmem>>, vector<1x1xf32>,
    return
  }
  func.func @transform_0(%arg0: i32, %arg1: i32) -> (i32, i32) {
    %c0_i32 = arith.constant 0 : i32
    %c0_i32_0 = arith.constant 0 : i32
    %c0_i32_1 = arith.constant 0 : i32
    return %c0_i32, %c0_i32_0 : i32, i32
  }
  func.func @transform_1(%arg0: i32, %arg1: i32) -> (i32, i32) {
    %c0_i32 = arith.constant 0 : i32
    %c0_i32_0 = arith.constant 0 : i32
    return %arg0, %c0_i32 : i32, i32
  }
  func.func @transform_2(%arg0: i32, %arg1: i32) -> (i32, i32) {
    %c0_i32 = arith.constant 0 : i32
    %c0_i32_0 = arith.constant 0 : i32
    return %arg1, %c0_i32 : i32, i32
  }
  func.func @transform_3(%arg0: i32, %arg1: i32) -> (i32, i32) {
    %c0_i32 = arith.constant 0 : i32
    %c0_i32_0 = arith.constant 0 : i32
    %c0_i32_1 = arith.constant 0 : i32
    return %c0_i32, %c0_i32_0 : i32, i32
  }
}

</mosaic_0001>

<bundles_post_ra>
// kernel: mmd_rbf.2
= control target key start
LH: loop header
LB: loop body
LE: loop exit
PB: predicated region body
PF: predicated region fallthrough
CT: control target
= control target key end

     0   :  { %vm22_vm0 = vcmask 261120   ;;  %vm15_vm1 = vcmask 253952   ;;  %v114_v6 = vmov 0.0   ;;  %s141_s0 = inlined_call_operand.vmem [shape: f32[16,32], index: 0, kind: input, shape index: {}]   ;;  %s142_s1 = inlined_call_operand.hbm [shape: f32[1,1], index: 1, kind: output, shape index: {}]  }
   0x1   :  { %v17_v0 = vld [vmem:[%s141_s0] sm:$0xff]  ;;  %v18_v1 = vld [vmem:[%s141_s0 + $0x8] sm:$0xff]  ;;  %16 = vst.msk [vmem:[#allocation3] sm:$0x1] %vm15_vm1, %v114_v6 }
   0x2   :  { %v20_v2 = vmul.f32 %v17_v0, %v17_v0  ;;  %v21_v3 = vmul.f32 %v18_v1, %v18_v1  ;;  %v40_v4 = vsel %vm22_vm0, %v17_v0, 0.0  ;;  %v41_v5 = vsel %vm22_vm0, %v18_v1, 0.0 }
   0x3   :  { %6 = vsyncpa [#allocation5], 0  ;;  %v42_v7 = vadd.f32 %v41_v5, %v40_v4  ;;  %vm13_vm2 = vcmask 0   ;;  %s115_s11 = smov [#allocation4]  }
   0x4   :  { %v23_v8 = vsel %vm22_vm0, %v20_v2, 0.0  ;;  %v24_v9 = vsel %vm22_vm0, %v21_v3, 0.0  ;;  %14 = vst.msk [vmem:[#allocation2] sm:$0x1] %vm13_vm2, %v114_v6  ;;  %s78_s12 = sshll.u32 %s115_s11, 4  ;;  %s79_s12 = int_to_ptr.vmem [resolvable:$true] %s78_s12 }
   0x5   :  { %v25_v10 = vadd.f32 %v24_v9, %v23_v8  ;;  %v43_v11 = vrot.slane %v42_v7, 4  ;;  %s92_s13 = scalar_lea.vmem %s79_s12, 16  ;;  %s96_s14 = scalar_lea.vmem %s79_s12, 32 }
   0x6   :  { %p93_p0 = scmp.ne.s32.totalorder %s79_s12, %s92_s13  ;;  %p97_p1 = scmp.lt.s32.totalorder %s79_s12, %s79_s12 }
   0x7   :  { %v44_v12 = vadd.f32 %v43_v11, %v42_v7  ;;  %26 = vadd.xlane.f32.xlu0 %v25_v10  ;;  %p98_p2 = scmp.lt.s32.totalorder %s96_s14, %s92_s13 }
   0x8   :  { %v39_v16 = vld [vmem:[#allocation3] sm:$0x1] }
   0x9   :  { %v45_v13 = vrot.slane %v44_v12, 2  ;;  %p99_p3 = por %p98_p2, %p97_p1 }
   0xb   :  { %v46_v14 = vadd.f32 %v45_v13, %v44_v12  ;;  %v19_v36 = vld [vmem:[#allocation2] sm:$0x1]  ;;  %p100_p4 = pnand %p99_p3, %p93_p0 }
   0xd   :  { %v47_v15 = vrot.slane %v46_v14, 1 }
   0xf   :  { %v48_v17 = vadd.f32 %v47_v15, %v46_v14 }
  0x11   :  { %v49_v18 = vadd.f32 %v48_v17, %v39_v16 }
  0x13   :  { %51 = vst.msk [vmem:[#allocation3] sm:$0x1] %vm15_vm1, %v49_v18 }
  0x1a   :  { %v52_v19 = vld [vmem:[#allocation3] sm:$0x1] }
  0x1b   :  { %v55_v20 = vmul.f32 %v52_v19, %v52_v19 }
  0x1d   :  { %v56_v21 = vsel %vm15_vm1, %v55_v20, 0.0 }
  0x1e   :  { %57 = vadd.xlane.f32.xlu0 %v56_v21 }
  0x90   :  { %v27_v22 = vpop.xlane.xlu0 %26 }
  0x91   :  { %v28_v23 = vrot.slane %v27_v22, 4 }
  0x93   :  { %v29_v24 = vadd.f32 %v28_v23, %v27_v22 }
  0x95   :  { %v30_v25 = vrot.slane %v29_v24, 2 }
  0x97   :  { %v31_v26 = vadd.f32 %v30_v25, %v29_v24 }
  0x99   :  { %v32_v27 = vrot.slane %v31_v26, 1 }
  0x9b   :  { %v33_v28 = vadd.f32 %v32_v27, %v31_v26 }
  0x9d   :  { %86 = vpush %v33_v28 }
  0xa7   :  { %v58_v29 = vpop.xlane.xlu0 %57 }
  0xa8   :  { %v59_v30 = vrot.slane %v58_v29, 4 }
  0xaa   :  { %v60_v31 = vadd.f32 %v59_v30, %v58_v29 }
  0xac   :  { %v61_v32 = vrot.slane %v60_v31, 2 }
  0xae   :  { %v62_v33 = vadd.f32 %v61_v32, %v60_v31 }
  0xb0   :  { %v63_v34 = vrot.slane %v62_v33, 1 }
  0xb2   :  { %v64_v35 = vadd.f32 %v63_v34, %v62_v33 }
  0xb4   :  { %88 = vpush %v64_v35 }
  0xce   :  { %s87_s0 = spop %86 }
  0xcf   :  { %v35_v37 = vstv %s87_s0 }
  0xd0   :  { %v36_v38 = vadd.f32 %v35_v37, %v19_v36 }
  0xd2   :  { %38 = vst.msk [vmem:[#allocation2] sm:$0x1] %vm13_vm2, %v36_v38 }
  0xd9   :  { %v53_v39 = vld [vmem:[#allocation2] sm:$0x1] }
  0xda   :  { %v54_v41 = vmul.f32 32.0, %v53_v39 }
  0xe5   :  { %s89_s10 = spop %88 }
  0xe6   :  { %v66_v40 = vstv %s89_s10 }
  0xe7   :  { %v67_v42 = vmul.f32 2.0, %v66_v40 }
  0xe9   :  { %v68_v43 = vsub.f32 %v54_v41, %v67_v42 }
  0xeb   :  { %v69_v44 = vmul.f32 0.004166667, %v68_v43 }
  0xed   :  { %v70_v45 = vmul.f32 0.25, %v69_v44 }
  0xef   :  { %71 = vst.msk [vmem:[#allocation4] sm:$0x1] %vm13_vm2, %v70_v45 }
  0xf0   :  { %103 = shalt.err (!%p100_p4)
}
  0xf1   :  { %81 = dma.vmem_to_hbm [thread:$0]  %s79_s12, 16, %s142_s1, [#allocation5]  }
  0xf2   :  { %112 = dma.done.wait [#allocation5], 16  }
  0xf3   :  { %113 = vsyncadd [#allocation5], 4294967280 }
  0xf4   :  { %85 = vsyncpa [#allocation5], 1 }

// kernel: mmd_rbf.3
= control target key start
LH: loop header
LB: loop body
LE: loop exit
PB: predicated region body
PF: predicated region fallthrough
CT: control target
= control target key end

     0   :  { %vm28_vm0 = vcmask 261120   ;;  %v404_v3 = vmov 0.0   ;;  %s475_s0 = inlined_call_operand.<no memory space> [shape: f32[1,1], index: 0, kind: input, shape index: {}]   ;;  %s476_s1 = inlined_call_operand.vmem [shape: f32[16,32], index: 1, kind: input, shape index: {}, may-alias: {1,2}]   ;;  %s477_s2 = inlined_call_operand.vmem [shape: f32[16,32], index: 2, kind: input, shape index: {}, may-alias: {1,2}]   ;;  %s478_s3 = inlined_call_operand.hbm [shape: f32[1,1], index: 3, kind: output, shape index: {}]  }
   0x1   :  { %v27_v0 = vld [vmem:[%s477_s2 + $0x8] sm:$0xff]  ;;  %v26_v1 = vld [vmem:[%s477_s2] sm:$0xff]  ;;  %361 = vmatprep.subr.mxu1 %v404_v3  ;;  %s244_s22 = smul.f32 16.0, %s475_s0 }
   0x2   :  { %v24_v2 = vld [vmem:[%s476_s1] sm:$0xff]  ;;  %354 = vmatprep.subr.msk.mxu0 %vm28_vm0, %v27_v0  ;;  %v125_v4 = vmul.f32 %v27_v0, %v27_v0  ;;  %v25_v6 = vld [vmem:[%s476_s1 + $0x8] sm:$0xff] }
   0x3   :  { %v116_v5 = vmul.f32 %v24_v2, %v24_v2 }
   0x4   :  { %9 = vsyncpa [#allocation4], 0  ;;  %355 = vmatpush3.xpose.msk.msra.mxu0 %vm28_vm0, %v27_v0  ;;  %358 = vmatprep.mubr.msk.f32.mxu0 %vm28_vm0, %v24_v2  ;;  %v117_v7 = vmul.f32 %v25_v6, %v25_v6  ;;  %v124_v8 = vmul.f32 %v26_v1, %v26_v1  ;;  %v245_v10 = vstv %s244_s22  ;;  %vm405_vm1 = vmmov 0   ;;  %s409_s2 = smov [#allocation3]  }
   0x5   :  { %362 = vmatpush3.xpose.msk.msra.mxu1 %vm28_vm0, %v125_v4  ;;  %356 = vmatprep.subr.msk.mxu0 %vm28_vm0, %v26_v1  ;;  %v118_v9 = vsel %vm28_vm0, %v116_v5, 0.0  ;;  %376 = vrcp.f32 %v245_v10  ;;  %v406_v12 = vmov 1.0   ;;  %v205_v14 = vlaneseq  ;;  %s332_s23 = sshll.u32 %s409_s2, 4  ;;  %s333_s23 = int_to_ptr.vmem [resolvable:$true] %s332_s23 }
   0x6   :  { %363 = vmatprep.subr.mxu1 %v404_v3  ;;  %365 = vmatprep.mubr.msk.f32.mxu1 %vm405_vm1, %v404_v3  ;;  %v121_v11 = vsel %vm28_vm0, %v117_v7, 0.0  ;;  %v407_v38 = vmov -0.015625   ;;  %v408_v40 = vmov 0.015625   ;;  %vm258_vm4 = vcmask 130048   ;;  %s382_s24 = scalar_lea.vmem %s333_s23, 16  ;;  %s386_s25 = scalar_lea.vmem %s333_s23, 32 }
   0x7   :  { %119 = vadd.xlane.f32.xlu0 %v118_v9  ;;  %v206_v15 = vshrl.u32 %v205_v14, 7  ;;  %v226_v37 = vand.u32 127, %v205_v14  ;;  %vm22_vm5 = vcmask 0   ;;  %p383_p0 = scmp.ne.s32.totalorder %s333_s23, %s382_s24  ;;  %p387_p1 = scmp.lt.s32.totalorder %s333_s23, %s333_s23 }
   0x8   :  { %357 = vmatpush3.xpose.msk.msra.mxu0 %vm28_vm0, %v26_v1  ;;  %23 = vst.msk [vmem:[#allocation3] sm:$0x1] %vm22_vm5, %v404_v3  ;;  %p388_p2 = scmp.lt.s32.totalorder %s386_s25, %s382_s24 }
   0x9   :  { %364 = vmatpush3.xpose.msk.msra.mxu1 %vm28_vm0, %v124_v8  ;;  %v207_v17 = vsub.s32 0, %v206_v15  ;;  %vm231_vm2 = vcmp.lt.s32.totalorder %v226_v37, 8  ;;  %vm238_vm3 = vcmp.lt.s32.totalorder %v226_v37, 16 }
   0xa   :  { %v232_v39 = vsel %vm231_vm2, 0.015625, %v407_v38  ;;  %v233_v41 = vsel %vm231_vm2, -0.015625, %v408_v40  ;;  %p389_p3 = por %p388_p2, %p387_p1 }
   0xb   :  { %359 = vmatmul.mubr.msk.f32.vlgmr.msra.gmra.mxu0 %vm28_vm0, %v25_v6  ;;  %122 = vadd.xlane.f32.xlu0 %v121_v11  ;;  %v241_v42 = vsel %vm238_vm3, %v232_v39, 0.0  ;;  %v242_v43 = vsel %vm238_vm3, %v233_v41, 0.0 }
   0xc   :  { %366 = vmatmul.mubr.msk.f32.vlgmr.msra.gmra.mxu1 %vm28_vm0, %v406_v12  ;;  %p390_p4 = pnand %p389_p3, %p383_p0 }
  0x12   :  { %v377_v13 = vpop.eup %376 }
  0x13   :  { %368 = vpush %v377_v13 }
  0x44   :  { %s369_s0 = spop %368 }
  0x45   :  { %s248_s1 = smul.f32 -1.0, %s369_s0 }
  0x47   :  { %v249_v30 = vstv %s248_s1 }
  0x90   :  { %v120_v16 = vpop.xlane.xlu0 %119 }
  0x94   :  { %v123_v20 = vpop.xlane.xlu0 %122 }
  0xcb   :  { %v360_v18 = vpop.f32.mrf.mxu0 }
  0xcc   :  { %v201_v19 = vpop.f32.mrf.mxu1  ;;  %v212_v25 = vmul.f32 2.0, %v360_v18 }
  0xcd   :  { %v208_v21 = vrot.slane %v201_v19, %v207_v17  ;;  %v107_v22 = vpop.f32.mrf.mxu0 }
  0xce   :  { %v211_v23 = vmul.f32 2.0, %v107_v22  ;;  %v367_v24 = vpop.f32.mrf.mxu1 }
  0xcf   :  { %v209_v26 = vadd.f32 %v208_v21, %v120_v16  ;;  %v210_v27 = vadd.f32 %v208_v21, %v123_v20 }
  0xd1   :  { %v213_v28 = vsub.f32 %v209_v26, %v211_v23  ;;  %v214_v29 = vsub.f32 %v210_v27, %v212_v25 }
  0xd3   :  { %v215_v31 = vmax.f32 %v213_v28, 0.0  ;;  %v216_v32 = vmax.f32 %v214_v29, 0.0 }
  0xd5   :  { %v250_v33 = vmul.f32 %v249_v30, %v215_v31  ;;  %v251_v34 = vmul.f32 %v249_v30, %v216_v32 }
  0xd7   :  { %v252_v35 = vmul.f32 1.442695, %v250_v33  ;;  %v254_v36 = vmul.f32 1.442695, %v251_v34  ;;  %v315_v34 = vld [vmem:[#allocation3] sm:$0x1] }
  0xd9   :  { %378 = vpow2.f32 %v252_v35 }
  0xda   :  { %380 = vpow2.f32 %v254_v36 }
  0xe6   :  { %v379_v44 = vpop.eup %378 }
  0xe7   :  { %v381_v45 = vpop.eup %380  ;;  %v256_v46 = vmul.f32 %v379_v44, %v241_v42  ;;  %v267_v47 = vmul.f32 %v379_v44, %v379_v44 }
  0xe8   :  { %v257_v48 = vmul.f32 %v381_v45, %v242_v43  ;;  %v268_v52 = vmul.f32 %v381_v45, %v381_v45 }
  0xe9   :  { %v259_v49 = vsel %vm258_vm4, %v256_v46, 0.0  ;;  %v269_v50 = vmul.f32 %v267_v47, %v241_v42  ;;  %v279_v51 = vmul.f32 %v267_v47, %v267_v47 }
  0xea   :  { %260 = vadd.xlane.f32.xlu1 %v259_v49  ;;  %v262_v56 = vsel %vm258_vm4, %v257_v48, 0.0  ;;  %v270_v57 = vmul.f32 %v268_v52, %v242_v43  ;;  %v280_v58 = vmul.f32 %v268_v52, %v268_v52 }
  0xeb   :  { %v271_v53 = vsel %vm258_vm4, %v269_v50, 0.0  ;;  %v281_v54 = vmul.f32 %v279_v51, %v241_v42  ;;  %v291_v55 = vmul.f32 %v279_v51, %v279_v51 }
  0xec   :  { %272 = vadd.xlane.f32.xlu0 %v271_v53  ;;  %v274_v62 = vsel %vm258_vm4, %v270_v57, 0.0  ;;  %v282_v63 = vmul.f32 %v280_v58, %v242_v43  ;;  %v292_v0 = vmul.f32 %v280_v58, %v280_v58 }
  0xed   :  { %v283_v59 = vsel %vm258_vm4, %v281_v54, 0.0  ;;  %v293_v60 = vmul.f32 %v291_v55, %v241_v42  ;;  %v303_v61 = vmul.f32 %v291_v55, %v291_v55 }
  0xee   :  { %263 = vadd.xlane.f32.xlu1 %v262_v56  ;;  %v286_v4 = vsel %vm258_vm4, %v282_v63, 0.0  ;;  %v294_v5 = vmul.f32 %v292_v0, %v242_v43  ;;  %v304_v6 = vmul.f32 %v292_v0, %v292_v0 }
  0xef   :  { %v295_v1 = vsel %vm258_vm4, %v293_v60, 0.0  ;;  %v305_v2 = vmul.f32 %v303_v61, %v241_v42 }
  0xf0   :  { %284 = vadd.xlane.f32.xlu0 %v283_v59  ;;  %v298_v8 = vsel %vm258_vm4, %v294_v5, 0.0  ;;  %v306_v9 = vmul.f32 %v304_v6, %v242_v43 }
  0xf1   :  { %v307_v7 = vsel %vm258_vm4, %v305_v2, 0.0 }
  0xf2   :  { %275 = vadd.xlane.f32.xlu1 %v274_v62  ;;  %v310_v10 = vsel %vm258_vm4, %v306_v9, 0.0 }
  0xf4   :  { %296 = vadd.xlane.f32.xlu0 %v295_v1 }
  0xf6   :  { %287 = vadd.xlane.f32.xlu1 %v286_v4 }
  0xf8   :  { %308 = vadd.xlane.f32.xlu0 %v307_v7 }
  0xfa   :  { %299 = vadd.xlane.f32.xlu1 %v298_v8 }
  0xfe   :  { %311 = vadd.xlane.f32.xlu1 %v310_v10 }
 0x173   :  { %v261_v11 = vpop.xlane.xlu1 %260 }
 0x175   :  { %v273_v12 = vpop.xlane.xlu0 %272 }
 0x176   :  { %v277_v18 = vadd.f32 %v273_v12, %v261_v11 }
 0x177   :  { %v264_v13 = vpop.xlane.xlu1 %263 }
 0x179   :  { %v285_v14 = vpop.xlane.xlu0 %284 }
 0x17a   :  { %v289_v21 = vadd.f32 %v285_v14, %v277_v18 }
 0x17b   :  { %v276_v15 = vpop.xlane.xlu1 %275 }
 0x17c   :  { %v278_v19 = vadd.f32 %v276_v15, %v264_v13 }
 0x17d   :  { %v297_v16 = vpop.xlane.xlu0 %296 }
 0x17e   :  { %v301_v24 = vadd.f32 %v297_v16, %v289_v21 }
 0x17f   :  { %v288_v17 = vpop.xlane.xlu1 %287 }
 0x180   :  { %v290_v22 = vadd.f32 %v288_v17, %v278_v19 }
 0x181   :  { %v309_v23 = vpop.xlane.xlu0 %308 }
 0x182   :  { %v313_v27 = vadd.f32 %v309_v23, %v301_v24 }
 0x183   :  { %v300_v20 = vpop.xlane.xlu1 %299 }
 0x184   :  { %v302_v25 = vadd.f32 %v300_v20, %v290_v22 }
 0x187   :  { %v312_v26 = vpop.xlane.xlu1 %311 }
 0x188   :  { %v314_v28 = vadd.f32 %v312_v26, %v302_v25 }
 0x18a   :  { %v316_v29 = vadd.f32 %v314_v28, %v313_v27 }
 0x18c   :  { %v317_v3 = vrot.slane %v316_v29, 4 }
 0x18e   :  { %v318_v30 = vadd.f32 %v317_v3, %v316_v29 }
 0x190   :  { %v319_v31 = vrot.slane %v318_v30, 2 }
 0x192   :  { %v320_v32 = vadd.f32 %v319_v31, %v318_v30 }
 0x194   :  { %v321_v33 = vrot.slane %v320_v32, 1 }
 0x196   :  { %v322_v35 = vadd.f32 %v321_v33, %v320_v32 }
 0x198   :  { %v323_v36 = vadd.f32 %v322_v35, %v315_v34 }
 0x19a   :  { %325 = vst.msk [vmem:[#allocation3] sm:$0x1] %vm22_vm5, %v323_v36 }
 0x19b   :  { %393 = shalt.err (!%p390_p4)
}
 0x19c   :  { %335 = dma.vmem_to_hbm [thread:$0]  %s333_s23, 16, %s478_s3, [#allocation4]  }
 0x19d   :  { %402 = dma.done.wait [#allocation4], 16  }
 0x19e   :  { %403 = vsyncadd [#allocation4], 4294967280 }
 0x19f   :  { %339 = vsyncpa [#allocation4], 1 }

</bundles_post_ra>
